<compile_context>
chip_gen: v7x
topology: tpu7x:2x2x1
jax: 0.10.0
libtpu: 0.0.40
codegen_flags: <defaults>
</compile_context>

<pallas_src>
import functools
import math

import jax
import jax.numpy as jnp
from jax.experimental import pallas as pl
from jax.experimental.pallas import tpu as pltpu


def bd_kernel(fuse_ref, rhs1_ref, rhs2_ref, gz_ref, dox_ref, *, hidden, c_pad):
    # fuse_ref : [tb, F]        bf16  batch tile of joint_feature
    # rhs1_ref : [F, H + N]     bf16  [ w_h | (wq @ key^T) / sqrt(C) ]
    # rhs2_ref : [N, c_pad + H] bf16  [ conf*prior (lane-padded) | (conf*prior) @ w_g ]
    fuse = fuse_ref[...]

    # MXU matmul #1: proj_h and the attention scores share the LHS `fuse`.
    hm = jnp.dot(fuse, rhs1_ref[...], preferred_element_type=jnp.float32)   # [tb, H+N]
    proj_h = hm[:, :hidden]                                                 # [tb, H]
    scores = hm[:, hidden:]                                                 # [tb, N]

    # Numerically-stable softmax over the confounder axis.
    m = jnp.max(scores, axis=-1, keepdims=True)
    e = jnp.exp(scores - m)
    denom = jnp.sum(e, axis=-1, keepdims=True)
    attn = (e * pl.reciprocal(denom, approx=True)).astype(jnp.bfloat16)     # [tb, N]

    # MXU matmul #2: g_z and proj_g share the LHS `attn`.
    #   g_z   = attn @ (confounder * prior)        (prior folded in wrapper)
    #   proj_g = attn @ ((confounder * prior) @ w_g)
    gp = jnp.dot(attn, rhs2_ref[...], preferred_element_type=jnp.float32)   # [tb, c_pad+H]
    gz_ref[...] = gp[:, :c_pad]

    # NOTE: the PyTorch line `do_x = joint_feature + g_z` is dead code
    # (immediately overwritten), so it is intentionally not materialized.
    dox_ref[...] = proj_h + gp[:, c_pad:]


def _pick_tb(B):
    # Single grid step for small/medium batches (one TensorCore on v5e/v6e;
    # per-step pipeline overhead ~600 cycles dwarfs the work at tiny B).
    if B <= 512:
        return B
    # Otherwise tile in multiples of 16 (bf16 sublane packing), capped at 512
    # rows so double-buffered f32 outputs stay small on v7x's 64 MiB VMEM.
    for t in (512, 256, 128, 64, 32, 16):
        if B % t == 0:
            return t
    return B  # TODO(synk): ragged batches would need padding; run one step.


def bd_forward(joint_feature, confounder, prior, params, *, tb=None):
    B, F = joint_feature.shape
    N, C = confounder.shape
    H = params["w_h"].shape[1]
    assert params["wq"].shape == (F, H) and params["wk"].shape == (C, H)
    assert params["w_g"].shape == (C, H)
    assert H % 128 == 0

    if tb is None:
        tb = _pick_tb(B)
    assert B % tb == 0

    c_pad = max(128, ((C + 127) // 128) * 128)   # lane-dense g_z output
    scale = 1.0 / math.sqrt(C)                   # con_size == num_gz

    # ---- batch-invariant precompute (f32, single cast to bf16) ----
    key = confounder @ params["wk"]                               # [N, H]
    m_score = (params["wq"] @ key.T) * scale                      # [F, N]
    rhs1 = jnp.concatenate([params["w_h"], m_score], axis=1)      # [F, H+N]
    rhs1 = rhs1.astype(jnp.bfloat16)

    sconf = confounder * prior                                    # [N, C]
    sconf_pad = jnp.pad(sconf, ((0, 0), (0, c_pad - C)))          # [N, c_pad]
    sconf_wg = sconf @ params["w_g"]                              # [N, H]
    rhs2 = jnp.concatenate([sconf_pad, sconf_wg], axis=1)         # [N, c_pad+H]
    rhs2 = rhs2.astype(jnp.bfloat16)

    fuse = joint_feature.astype(jnp.bfloat16)                     # [B, F]

    kernel = functools.partial(bd_kernel, hidden=H, c_pad=c_pad)
    # NOTE: rhs1/rhs2 are batch-invariant (constant index_map); at these sizes
    # their double-buffer cost is negligible so pipeline_mode=pl.Buffered(1)
    # is not applied (keeps compatibility across Pallas versions).

    g_z_pad, do_x = pl.pallas_call(
        kernel,
        out_shape=(
            jax.ShapeDtypeStruct((B, c_pad), jnp.float32),  # g_z (padded)
            jax.ShapeDtypeStruct((B, H), jnp.float32),      # do_x
        ),
        grid_spec=pltpu.PrefetchScalarGridSpec(
            num_scalar_prefetch=0,
            grid=(B // tb,),
            in_specs=[
                pl.BlockSpec((tb, F), lambda i: (i, 0)),          # joint_feature tile
                pl.BlockSpec((F, H + N), lambda i: (0, 0)),       # [w_h | M]
                pl.BlockSpec((N, c_pad + H), lambda i: (0, 0)),   # [sconf | sconf@w_g]
            ],
            out_specs=[
                pl.BlockSpec((tb, c_pad), lambda i: (i, 0)),
                pl.BlockSpec((tb, H), lambda i: (i, 0)),
            ],
        ),
        compiler_params=pltpu.CompilerParams(
            dimension_semantics=("parallel",)),
    )(fuse, rhs1, rhs2)

    return g_z_pad[:, :C], do_x


def _xavier_normal(key, shape):
    fan_in, fan_out = shape[0], shape[1]
    std = math.sqrt(2.0 / (fan_in + fan_out))
    return std * jax.random.normal(key, shape, dtype=jnp.float32)


def make_params(key, num_joint_feature, num_gz, hidden=768):
    k1, k2, k3, k4 = jax.random.split(key, 4)
    # nn.Linear(fuse_size, 768) weight is [768, fuse_size]; stored transposed here.
    wq = _xavier_normal(k1, (hidden, num_joint_feature)).T   # query.weight^T : [F, H]
    wk = _xavier_normal(k2, (hidden, num_gz)).T              # key.weight^T   : [C, H]
    w_h = _xavier_normal(k3, (num_joint_feature, hidden))    # [F, H]
    w_g = _xavier_normal(k4, (num_gz, hidden))               # [C, H]
    return {"wq": wq, "wk": wk, "w_h": w_h, "w_g": w_g}


def bd_reference(joint_feature, confounder, prior, params):
    # Pure-JAX f32 reference of the same forward, for a sanity check.
    C = confounder.shape[1]
    q = joint_feature @ params["wq"]
    k = confounder @ params["wk"]
    scores = (q @ k.T) / math.sqrt(C)
    attn = jax.nn.softmax(scores, axis=-1)
    g_z = (attn[:, :, None] * confounder[None, :, :] * prior[None, :, :]).sum(1)
    do_x = joint_feature @ params["w_h"] + g_z @ params["w_g"]
    return g_z, do_x


if __name__ == "__main__":
    B = 16          # batch
    F = 32          # num_joint_feature
    C = 32          # num_gz (== F so the dead `joint_feature + g_z` line is well-formed)
    N = 16          # confounder dictionary size
    H = 768         # hidden size hard-coded to 768 in the module

    root = jax.random.PRNGKey(0)
    kp, kx, kc, kpr = jax.random.split(root, 4)

    params = make_params(kp, F, C, H)
    joint_feature = jax.random.normal(kx, (B, F), dtype=jnp.float32)
    confounder = jax.random.normal(kc, (N, C), dtype=jnp.float32)
    prior = jax.nn.softmax(jax.random.normal(kpr, (N,), dtype=jnp.float32))[:, None]

    fwd = jax.jit(bd_forward, static_argnames=("tb",))
    g_z, do_x = fwd(joint_feature, confounder, prior, params)
    jax.block_until_ready((g_z, do_x))

    g_z_ref, do_x_ref = bd_reference(joint_feature, confounder, prior, params)
    # bf16 matmul operands (f32 accumulation) -> compare at bf16-level tolerance.
    assert jnp.allclose(g_z, g_z_ref, atol=3e-2, rtol=3e-2), \
        float(jnp.max(jnp.abs(g_z - g_z_ref)))
    assert jnp.allclose(do_x, do_x_ref, atol=3e-2, rtol=3e-2), \
        float(jnp.max(jnp.abs(do_x - do_x_ref)))

    print("KERNEL_OK")
</pallas_src>

<mosaic_0001>
module attributes {stable_mosaic.version = 11 : i64} {
  func.func @bd_kernel(%arg0: i32, %arg1: memref<16x32xbf16, #tpu.memory_space<vmem>>, %arg2: memref<32x784xbf16, #tpu.memory_space<vmem>>, %arg3: memref<16x896xbf16, #tpu.memory_space<vmem>>, %arg4: memref<16x128xf32, #tpu.memory_space<vmem>>, %arg5: memref<16x768xf32, #tpu.memory_space<vmem>>) attributes {dimension_semantics = [#tpu.dimension_semantics<parallel>], iteration_bounds = array<i64: 1>, scalar_prefetch = 0 : i64, scratch_operands = 0 : i64, tpu.core_type = #tpu.core_type<tc>, window_params = [{transform_indices = @transform_0, window_bounds = array<i64: 16, 32>}, {pipeline_mode = #tpu.pipeline_mode<synchronous>, transform_indices = @transform_1, window_bounds = array<i64: 32, 784>}, {pipeline_mode = #tpu.pipeline_mode<synchronous>, transform_indices = @transform_2, window_bounds = array<i64: 16, 896>}, {transform_indices = @transform_3, window_bounds = array<i64: 16, 128>}, {transform_indices = @transform_4, window_bounds = array<i64: 16, 768>}]} {
    %c0 = arith.constant 0 : index
    %c0_0 = arith.constant 0 : index
    %0 = vector.load %arg1[%c0, %c0_0] : memref<16x32xbf16, #tpu.memory_space<vmem>>, vector<16x32xbf16>
    %c0_1 = arith.constant 0 : index
    %c0_2 = arith.constant 0 : index
    %1 = vector.load %arg2[%c0_1, %c0_2] : memref<32x784xbf16, #tpu.memory_space<vmem>>, vector<32x784xbf16>
    %cst = arith.constant dense<0.000000e+00> : vector<16x784xf32>
    %2 = tpu.matmul %0, %1, %cst {dimension_numbers = #tpu.dot_dimension_numbers<[1], [0], [0], [1], [0, 0, 1, 1], [], []>} : vector<16x32xbf16>, vector<32x784xbf16>, vector<16x784xf32> -> vector<16x784xf32>
    %3 = vector.extract_strided_slice %2 {offsets = [0, 0], sizes = [16, 768], strides = [1, 1]} : vector<16x784xf32> to vector<16x768xf32>
    %4 = vector.extract_strided_slice %2 {offsets = [0, 768], sizes = [16, 16], strides = [1, 1]} : vector<16x784xf32> to vector<16x16xf32>
    %cst_3 = arith.constant dense<0xFF800000> : vector<16xf32>
    %5 = vector.multi_reduction <maximumf>, %4, %cst_3 [1] : vector<16x16xf32> to vector<16xf32>
    %6 = vector.shape_cast %5 : vector<16xf32> to vector<16x1xf32>
    %7 = vector.broadcast %6 : vector<16x1xf32> to vector<16x16xf32>
    %8 = arith.subf %4, %7 : vector<16x16xf32>
    %9 = math.exp %8 : vector<16x16xf32>
    %cst_4 = arith.constant dense<0.000000e+00> : vector<16xf32>
    %10 = vector.multi_reduction <add>, %9, %cst_4 [1] : vector<16x16xf32> to vector<16xf32>
    %11 = vector.shape_cast %10 : vector<16xf32> to vector<16x1xf32>
    %12 = tpu.reciprocal %11 {approx = true} : vector<16x1xf32> -> vector<16x1xf32>
    %13 = vector.broadcast %12 : vector<16x1xf32> to vector<16x16xf32>
    %14 = arith.mulf %9, %13 : vector<16x16xf32>
    %15 = arith.truncf %14 : vector<16x16xf32> to vector<16x16xbf16>
    %c0_5 = arith.constant 0 : index
    %c0_6 = arith.constant 0 : index
    %16 = vector.load %arg3[%c0_5, %c0_6] : memref<16x896xbf16, #tpu.memory_space<vmem>>, vector<16x896xbf16>
    %cst_7 = arith.constant dense<0.000000e+00> : vector<16x896xf32>
    %17 = tpu.matmul %15, %16, %cst_7 {dimension_numbers = #tpu.dot_dimension_numbers<[1], [0], [0], [1], [0, 0, 1, 1], [], []>} : vector<16x16xbf16>, vector<16x896xbf16>, vector<16x896xf32> -> vector<16x896xf32>
    %18 = vector.extract_strided_slice %17 {offsets = [0, 0], sizes = [16, 128], strides = [1, 1]} : vector<16x896xf32> to vector<16x128xf32>
    %c0_8 = arith.constant 0 : index
    %c0_9 = arith.constant 0 : index
    %19 = vector.load %arg4[%c0_8, %c0_9] : memref<16x128xf32, #tpu.memory_space<vmem>>, vector<16x128xf32>
    tpu.vector_store %arg4[%c0_8, %c0_9], %18 {strides = array<i32>} : memref<16x128xf32, #tpu.memory_space<vmem>>, vector<16x128xf32>,
    %20 = vector.extract_strided_slice %17 {offsets = [0, 128], sizes = [16, 768], strides = [1, 1]} : vector<16x896xf32> to vector<16x768xf32>
    %21 = arith.addf %3, %20 : vector<16x768xf32>
    %c0_10 = arith.constant 0 : index
    %c0_11 = arith.constant 0 : index
    %22 = vector.load %arg5[%c0_10, %c0_11] : memref<16x768xf32, #tpu.memory_space<vmem>>, vector<16x768xf32>
    tpu.vector_store %arg5[%c0_10, %c0_11], %21 {strides = array<i32>} : memref<16x768xf32, #tpu.memory_space<vmem>>, vector<16x768xf32>,
    return
  }
  func.func @transform_0(%arg0: i32) -> (i32, i32) {
    %c0_i32 = arith.constant 0 : i32
    %c0_i32_0 = arith.constant 0 : i32
    return %arg0, %c0_i32 : i32, i32
  }
  func.func @transform_1(%arg0: i32) -> (i32, i32) {
    %c0_i32 = arith.constant 0 : i32
    %c0_i32_0 = arith.constant 0 : i32
    %c0_i32_1 = arith.constant 0 : i32
    return %c0_i32, %c0_i32_0 : i32, i32
  }
  func.func @transform_2(%arg0: i32) -> (i32, i32) {
    %c0_i32 = arith.constant 0 : i32
    %c0_i32_0 = arith.constant 0 : i32
    %c0_i32_1 = arith.constant 0 : i32
    return %c0_i32, %c0_i32_0 : i32, i32
  }
  func.func @transform_3(%arg0: i32) -> (i32, i32) {
    %c0_i32 = arith.constant 0 : i32
    %c0_i32_0 = arith.constant 0 : i32
    return %arg0, %c0_i32 : i32, i32
  }
  func.func @transform_4(%arg0: i32) -> (i32, i32) {
    %c0_i32 = arith.constant 0 : i32
    %c0_i32_0 = arith.constant 0 : i32
    return %arg0, %c0_i32 : i32, i32
  }
}

</mosaic_0001>

<bundles_post_ra>
// kernel: bd_forward.1
= control target key start
LH: loop header
LB: loop body
LE: loop exit
PB: predicated region body
PF: predicated region fallthrough
CT: control target
= control target key end

     0   :  { %10 = vsyncpa [#allocation3], 0  ;;  %v732_v2 = vmov 0   ;;  %vm114_vm0 = vcmask 261120   ;;  %v733_v7 = vmov 0.0   ;;  %vm734_vm1 = vmmov 0   ;;  %s900_s0 = inlined_call_operand.vmem [shape: bf16[16,32], index: 0, kind: input, shape index: {}]   ;;  %s901_s1 = inlined_call_operand.vmem [shape: bf16[32,784], index: 1, kind: input, shape index: {}]   ;;  %s902_s2 = inlined_call_operand.vmem [shape: bf16[16,896], index: 2, kind: input, shape index: {}]   ;;  %s903_s3 = inlined_call_operand.hbm [shape: f32[16,128], index: 3, kind: output, shape index: {0}]   ;;  %s904_s4 = inlined_call_operand.hbm [shape: f32[16,768], index: 4, kind: output, shape index: {1}]  }
   0x1   :  { %v645_v0 = vld [vmem:[%s901_s1 + $0xc] ss:$28 sps:$4 sm:$0xff]   ;;  %193 = vmatprep.mubr.bf16.mxu1 %v732_v2  ;;  %150 = vmatprep.mubr.bf16.mxu0 %v732_v2  ;;  %v648_v3 = vld [vmem:[%s901_s1 + $0x44] ss:$28 sps:$4 sm:$0xff]   ;;  %v652_v6 = vld [vmem:[%s901_s1 + $0x18] ss:$28 sps:$4 sm:$0xff]  }
   0x2   :  { %v647_v1 = vld [vmem:[%s901_s1 + $0x8] ss:$28 sps:$4 sm:$0xff]   ;;  %161 = vmatprep.subr.bf16.mxu1 %v645_v0  ;;  %v650_v4 = vld [vmem:[%s901_s1 + $0x40] ss:$28 sps:$4 sm:$0xff]   ;;  %v653_v8 = vld [vmem:[%s901_s1 + $0x50] ss:$28 sps:$4 sm:$0xff]  }
   0x3   :  { %162 = vmatpush1.bf16.msra.mxu1 %v647_v1  ;;  %v651_v5 = vld [vmem:[%s900_s0] sm:$0xff]  }
   0x4   :  { %163 = vmatprep.subr.bf16.mxu1 %v648_v3 }
   0x7   :  { %164 = vmatpush1.bf16.msra.mxu1 %v650_v4 }
   0x8   :  { %622 = vmatprep.subr.bf16.mxu1 %v733_v7 }
   0xa   :  { %603 = vmatmul.mubr.msk.bf16.vlgmr.msra.gmra.mrb[0].mxu1 %vm114_vm0, %v651_v5 }
   0xb   :  { %623 = vmatpush3.bf16.msra.mxu1 %v652_v6  ;;  %626 = vmatprep.mubr.msk.bf16.mxu1 %vm734_vm1, %v733_v7 }
   0xc   :  { %11 = vsyncpa [#allocation5], 0  ;;  %624 = vmatprep.subr.bf16.mxu1 %v733_v7  ;;  %vm288_vm2 = vcmask 130048   ;;  %v654_v19 = vld [vmem:[%s901_s1 + $0x4] ss:$28 sps:$4 sm:$0xff]  }
   0xd   :  { %v656_v20 = vld [vmem:[%s901_s1] ss:$28 sps:$4 sm:$0xff]   ;;  %118 = vmatprep.subr.bf16.mxu0 %v654_v19  ;;  %v659_v22 = vld [vmem:[%s901_s1 + $0x38] ss:$28 sps:$4 sm:$0xff]   ;;  %v660_v34 = vld [vmem:[%s901_s1 + $0x10] ss:$28 sps:$4 sm:$0xff]  }
   0xe   :  { %v657_v21 = vld [vmem:[%s901_s1 + $0x3c] ss:$28 sps:$4 sm:$0xff]   ;;  %119 = vmatpush1.bf16.msra.mxu0 %v656_v20  ;;  %v662_v33 = vld [vmem:[%s901_s1 + $0x14] ss:$28 sps:$4 sm:$0xff]   ;;  %v665_v35 = vld [vmem:[%s901_s1 + $0x4c] ss:$28 sps:$4 sm:$0xff]  }
   0xf   :  { %625 = vmatpush3.bf16.msra.mxu1 %v653_v8  ;;  %120 = vmatprep.subr.bf16.mxu0 %v657_v21  ;;  %v663_v36 = vld [vmem:[%s901_s1 + $0x48] ss:$28 sps:$4 sm:$0xff]   ;;  %v666_v39 = vld [vmem:[%s902_s2] ss:$28 sps:$4 sm:$0xff]   ;;  %v674_v41 = vld [vmem:[%s902_s2 + $0x14] ss:$28 sps:$4 sm:$0xff]  }
  0x10   :  { %v668_v37 = vld [vmem:[%s902_s2 + $0x4] ss:$28 sps:$4 sm:$0xff]   ;;  %v671_v38 = vld [vmem:[%s902_s2 + $0xc] ss:$28 sps:$4 sm:$0xff]   ;;  %v675_v53 = vld [vmem:[%s902_s2 + $0x18] ss:$28 sps:$4 sm:$0xff]  }
  0x11   :  { %v669_v40 = vld [vmem:[%s902_s2 + $0x8] ss:$28 sps:$4 sm:$0xff]   ;;  %402 = vmatprep.subr.bf16.mxu1 %v671_v38  ;;  %v672_v52 = vld [vmem:[%s902_s2 + $0x10] ss:$28 sps:$4 sm:$0xff]   ;;  %s735_s2 = smov [#allocation2]  }
  0x12   :  { %627 = vmatmul.mubr.msk.bf16.vlgmr.msra.gmra.mrb[4].mxu1 %vm114_vm0, %v651_v5  ;;  %121 = vmatpush1.bf16.msra.mxu0 %v659_v22  ;;  %s560_s30 = sshll.u32 %s735_s2, 4  ;;  %s865_s30 = int_to_ptr.vmem [resolvable:$true] %s560_s30 }
  0x13   :  { %434 = vmatprep.mubr.bf16.mxu1 %v732_v2  ;;  %204 = vmatprep.subr.bf16.mxu0 %v662_v33  ;;  %s684_s5 = scalar_lea.vmem %s865_s30, 256  ;;  %p689_p1 = scmp.lt.s32.totalorder %s865_s30, %s865_s30 }
  0x14   :  { %403 = vmatpush1.bf16.msra.mxu1 %v669_v40  ;;  %p685_p0 = scmp.ne.s32.totalorder %s865_s30, %s684_s5  ;;  %p690_p2 = scmp.lt.s32.totalorder %s684_s5, %s684_s5 }
  0x15   :  { %602 = vmatmul.mubr.msk.bf16.vlgmr.msra.gmra.mrb[0].mxu0 %vm114_vm0, %v651_v5  ;;  %630 = vmatprep.subr.bf16.mxu1 %v733_v7 }
  0x16   :  { %236 = vmatprep.mubr.bf16.mxu0 %v732_v2  ;;  %205 = vmatpush1.bf16.msra.mxu0 %v660_v34  ;;  %p691_p3 = por %p690_p2, %p689_p1 }
  0x17   :  { %206 = vmatprep.subr.bf16.mxu0 %v665_v35 }
  0x18   :  { %p692_p4 = pnand %p691_p3, %p685_p0 }
  0x1a   :  { %207 = vmatpush1.bf16.msra.mxu0 %v663_v36 }
  0x1b   :  { %359 = vmatprep.subr.bf16.mxu0 %v668_v37 }
  0x1d   :  { %604 = vmatmul.mubr.msk.bf16.vlgmr.msra.gmra.mrb[4].mxu0 %vm114_vm0, %v651_v5 }
  0x1e   :  { %391 = vmatprep.mubr.bf16.mxu0 %v732_v2  ;;  %360 = vmatpush1.bf16.msra.mxu0 %v666_v39 }
  0x1f   :  { %445 = vmatprep.subr.bf16.mxu0 %v674_v41 }
  0xdd   :  { %v796_v9 = vpop.f32.mrb[0].mxu1 }
  0xde   :  { %v798_v10 = vpop.f32.mrb[1].mxu1 }
  0xdf   :  { %v800_v11 = vpop.f32.mrb[2].mxu1 }
  0xe0   :  { %v802_v12 = vpop.f32.mrb[3].mxu1 }
  0xe5   :  { %v281_v13 = vpop.f32.mrb[4].mxu1 }
  0xe6   :  { %v628_v14 = vpop.f32.mrb[5].mxu1  ;;  %v289_v15 = vsel %vm288_vm2, %v281_v13, -inf }
  0xe7   :  { %290 = vmax.xlane.f32.xlu0 %v289_v15  ;;  %v284_v16 = vpop.f32.mrb[6].mxu1 }
  0xe8   :  { %v629_v17 = vpop.f32.mrb[7].mxu1  ;;  %v292_v18 = vsel %vm288_vm2, %v284_v16, -inf  ;;  %v152_v42 = vpop.f32.mrb[0].mxu0 }
  0xe9   :  { %v154_v43 = vpop.f32.mrb[1].mxu0 }
  0xea   :  { %v156_v44 = vpop.f32.mrb[2].mxu0 }
  0xeb   :  { %293 = vmax.xlane.f32.xlu0 %v292_v18  ;;  %v158_v45 = vpop.f32.mrb[3].mxu0 }
  0xf0   :  { %v238_v55 = vpop.f32.mrb[4].mxu0 }
  0xf1   :  { %v240_v56 = vpop.f32.mrb[5].mxu0 }
  0xf2   :  { %v242_v57 = vpop.f32.mrb[6].mxu0 }
  0xf3   :  { %v244_v58 = vpop.f32.mrb[7].mxu0 }
 0x174   :  { %v291_v23 = vpop.xlane.xlu0 %290 }
 0x175   :  { %v295_v24 = vsub.f32 %v281_v13, %v291_v23 }
 0x177   :  { %v297_v25 = vmul.f32 1.442695, %v295_v24 }
 0x178   :  { %v294_v26 = vpop.xlane.xlu0 %293 }
 0x179   :  { %676 = vpow2.f32 %v297_v25  ;;  %v296_v27 = vsub.f32 %v284_v16, %v294_v26 }
 0x17b   :  { %v299_v28 = vmul.f32 1.442695, %v296_v27 }
 0x17d   :  { %678 = vpow2.f32 %v299_v28 }
 0x183   :  { %v677_v29 = vpop.eup %676 }
 0x184   :  { %v301_v30 = vsel %vm288_vm2, %v677_v29, 0.0 }
 0x185   :  { %302 = vadd.xlane.f32.xlu1 %v301_v30 }
 0x187   :  { %v679_v31 = vpop.eup %678 }
 0x188   :  { %v304_v32 = vsel %vm288_vm2, %v679_v31, 0.0 }
 0x189   :  { %305 = vadd.xlane.f32.xlu1 %v304_v32 }
 0x212   :  { %v303_v46 = vpop.xlane.xlu1 %302 }
 0x213   :  { %680 = vrcp.f32 %v303_v46 }
 0x216   :  { %v306_v47 = vpop.xlane.xlu1 %305 }
 0x217   :  { %682 = vrcp.f32 %v306_v47 }
 0x21d   :  { %v681_v48 = vpop.eup %680 }
 0x21e   :  { %v309_v50 = vmul.f32 %v681_v48, %v677_v29 }
 0x221   :  { %v683_v49 = vpop.eup %682 }
 0x222   :  { %v310_v51 = vmul.f32 %v683_v49, %v679_v31 }
 0x224   :  { %v311_v54 = vpack.c.bf16 %v310_v51, %v309_v50 }
 0x226   :  { %613 = vmatmul.mubr.msk.bf16.vlgmr.msra.gmra.mrb[8].mxu0 %vm288_vm2, %v311_v54  ;;  %614 = vmatmul.mubr.msk.bf16.vlgmr.msra.gmra.mrb[8].mxu1 %vm288_vm2, %v311_v54 }
 0x227   :  { %446 = vmatpush1.bf16.msra.mxu0 %v672_v52  ;;  %631 = vmatpush3.bf16.msra.mxu1 %v675_v53 }
 0x228   :  { %477 = vmatprep.mubr.bf16.mxu0 %v732_v2  ;;  %632 = vmatprep.mubr.msk.bf16.mxu1 %vm734_vm1, %v733_v7 }
 0x22e   :  { %615 = vmatmul.mubr.msk.bf16.vlgmr.msra.gmra.mrb[12].mxu0 %vm288_vm2, %v311_v54  ;;  %633 = vmatmul.mubr.msk.bf16.vlgmr.msra.gmra.mrb[12].mxu1 %vm288_vm2, %v311_v54 }
 0x2f9   :  { %v393_v59 = vpop.f32.mrb[8].mxu0  ;;  %v436_v60 = vpop.f32.mrb[8].mxu1 }
 0x2fa   :  { %529 = vst [vmem:[#allocation2] sm:$0xff] %v393_v59  ;;  %v532_v61 = vadd.f32 %v436_v60, %v154_v43  ;;  %v395_v62 = vpop.f32.mrb[9].mxu0  ;;  %v438_v63 = vpop.f32.mrb[9].mxu1 }
 0x2fb   :  { %v531_v0 = vadd.f32 %v395_v62, %v152_v42  ;;  %v533_v1 = vadd.f32 %v438_v63, %v796_v9  ;;  %v397_v2 = vpop.f32.mrb[10].mxu0  ;;  %v440_v3 = vpop.f32.mrb[10].mxu1 }
 0x2fc   :  { %544 = vst [vmem:[#allocation4 + $0x8] sm:$0xff] %v532_v61  ;;  %530 = vst [vmem:[#allocation2 + $0x8] sm:$0xff] %v397_v2  ;;  %v538_v4 = vadd.f32 %v440_v3, %v158_v45  ;;  %v399_v5 = vpop.f32.mrb[11].mxu0  ;;  %v442_v6 = vpop.f32.mrb[11].mxu1 }
 0x2fd   :  { %543 = vst [vmem:[#allocation4] sm:$0xff] %v531_v0  ;;  %545 = vst [vmem:[#allocation4 + $0x10] sm:$0xff] %v533_v1  ;;  %v537_v7 = vadd.f32 %v399_v5, %v156_v44  ;;  %v539_v8 = vadd.f32 %v442_v6, %v800_v11 }
 0x2fe   :  { %695 = shalt.err (!%p692_p4)
}
 0x2ff   :  { %s696_s8 = scalar_lea.hbm %s903_s3, 256 }
 0x300   :  { %p697_p5 = scmp.ne.s32.totalorder %s903_s3, %s696_s8  ;;  %p700_p6 = scmp.lt.u32.totalorder %s696_s8, %s903_s3 }
 0x302   :  { %p702_p7 = pnand %p700_p6, %p697_p5 }
 0x304   :  { %705 = shalt.err (!%p702_p7)
}
 0x305   :  { %s736_s13 = smov 128   ;;  %s737_s14 = smov 8   ;;  %550 = vst [vmem:[#allocation4 + $0x38] sm:$0xff] %v538_v4  ;;  %549 = vst [vmem:[#allocation4 + $0x30] sm:$0xff] %v537_v7  ;;  %v479_v9 = vpop.f32.mrb[12].mxu0  ;;  %v522_v11 = vpop.f32.mrb[12].mxu1 }
 0x306   :  { %566 = dma.vmem_to_hbm [thread:$0]  %s865_s30, 256, %s903_s3, [#allocation3], %s736_s13, %s736_s13, %s737_s14   ;;  %551 = vst [vmem:[#allocation4 + $0x40] sm:$0xff] %v539_v8  ;;  %v534_v13 = vadd.f32 %v479_v9, %v798_v10  ;;  %v536_v14 = vadd.f32 %v522_v11, %v240_v56  ;;  %v481_v15 = vpop.f32.mrb[13].mxu0  ;;  %v634_v16 = vpop.f32.mrb[13].mxu1 }
 0x307   :  { %s738_s17 = smov [#allocation4]   ;;  %v535_v17 = vadd.f32 %v481_v15, %v238_v55  ;;  %v483_v18 = vpop.f32.mrb[14].mxu0  ;;  %v525_v19 = vpop.f32.mrb[14].mxu1 }
 0x308   :  { %s572_s18 = sshll.u32 %s738_s17, 4  ;;  %546 = vst [vmem:[#allocation4 + $0x18] sm:$0xff] %v534_v13  ;;  %548 = vst [vmem:[#allocation4 + $0x28] sm:$0xff] %v536_v14  ;;  %v540_v20 = vadd.f32 %v483_v18, %v802_v12  ;;  %v542_v21 = vadd.f32 %v525_v19, %v244_v58  ;;  %v485_v22 = vpop.f32.mrb[15].mxu0  ;;  %v635_v23 = vpop.f32.mrb[15].mxu1  ;;  %s573_s18 = int_to_ptr.vmem [resolvable:$true] %s572_s18 }
 0x309   :  { %547 = vst [vmem:[#allocation4 + $0x20] sm:$0xff] %v535_v17  ;;  %v541_v24 = vadd.f32 %v485_v22, %v242_v57  ;;  %s706_s3 = scalar_lea.vmem %s573_s18, 1536  ;;  %p711_p9 = scmp.lt.s32.totalorder %s573_s18, %s573_s18 }
 0x30a   :  { %552 = vst [vmem:[#allocation4 + $0x48] sm:$0xff] %v540_v20  ;;  %554 = vst [vmem:[#allocation4 + $0x58] sm:$0xff] %v542_v21  ;;  %p707_p8 = scmp.ne.s32.totalorder %s573_s18, %s706_s3  ;;  %p712_p10 = scmp.lt.s32.totalorder %s706_s3, %s706_s3 }
 0x30b   :  { %553 = vst [vmem:[#allocation4 + $0x50] sm:$0xff] %v541_v24 }
 0x30c   :  { %p713_p11 = por %p712_p10, %p711_p9 }
 0x30e   :  { %p714_p12 = pnand %p713_p11, %p707_p8 }
 0x310   :  { %717 = shalt.err (!%p714_p12)
}
 0x311   :  { %s718_s21 = scalar_lea.hbm %s904_s4, 1536 }
 0x312   :  { %p719_p13 = scmp.ne.s32.totalorder %s904_s4, %s718_s21  ;;  %p722_p0 = scmp.lt.u32.totalorder %s718_s21, %s904_s4 }
 0x314   :  { %p724_p1 = pnand %p722_p0, %p719_p13 }
 0x316   :  { %727 = shalt.err (!%p724_p1)
}
 0x317   :  { %s739_s25 = smov 768   ;;  %s740_s26 = smov 48  }
 0x318   :  { %578 = dma.vmem_to_hbm [thread:$0]  %s573_s18, 1536, %s904_s4, [#allocation5], %s739_s25, %s739_s25, %s740_s26  }
 0x319   :  { %728 = dma.done.wait [#allocation3], 256  }
 0x31a   :  { %729 = vsyncadd [#allocation3], 4294967040 }
 0x31b   :  { %730 = dma.done.wait [#allocation5], 1536  }
 0x31c   :  { %731 = vsyncadd [#allocation5], 4294965760 }
 0x31d   :  { %585 = vsyncpa [#allocation3], 1 }
 0x31e   :  { %586 = vsyncpa [#allocation5], 1 }

</bundles_post_ra>
